<compile_context>
chip_gen: v7x
topology: tpu7x:2x2x1
jax: 0.10.0
libtpu: 0.0.40
codegen_flags: <defaults>
</compile_context>

<pallas_src>
import functools

import numpy as np
import jax
import jax.numpy as jnp
from jax import lax
from jax.experimental import pallas as pl
from jax.experimental.pallas import tpu as pltpu  # noqa: F401  (kept for TPU-path extensions)

try:
    from scipy.optimize import linear_sum_assignment as _scipy_lsa
except Exception:  # pragma: no cover - scipy may be absent in the sandbox
    _scipy_lsa = None

ALPHA = 0.5
N_ITERS = 10


def _round_up(x, m):
    return ((x + m - 1) // m) * m


# ---------------------------------------------------------------------------
# Pallas kernel: fused Gumbel transform + identity + linear-domain Sinkhorn.
#
# Works on a lane-dense (n, LANES) tile (LANES = 128-multiple >= n).  Padded
# lanes are zeroed once; their column sums are made neutral (=1) with a cheap
# VPU add so every iteration stays full-vreg and division-safe.
# Linear-domain renormalization (exp once, then divide by row/col sums) is
# mathematically identical to the PyTorch log-domain logsumexp form followed
# by exp.  n_iters is a small static constant -> unrolled trace.
# ---------------------------------------------------------------------------
def _sinkhorn_kernel(u_ref, p_ref, *, alpha, n_iters, n):
    rows, lanes = u_ref.shape
    eps = jnp.float32(1e-20)

    # Gumbel(0, 1) noise from uniform input (EUP logs, off the VPU slot).
    u = u_ref[...]
    noise = -jnp.log(-jnp.log(u + eps) + eps)

    row = lax.broadcasted_iota(jnp.int32, (rows, lanes), 0)
    col = lax.broadcasted_iota(jnp.int32, (rows, lanes), 1)
    identity = (row == col).astype(jnp.float32)
    lane_valid = (col < n).astype(jnp.float32)          # (rows, lanes) 0/1 mask
    col_neutral = jnp.float32(1.0) - lane_valid[:1, :]  # 1 on padded lanes

    log_alpha = identity + noise * jnp.float32(alpha)

    # exp once; kill padded lanes so they never contribute to a sum.
    p = jnp.exp(log_alpha) * lane_valid

    for _ in range(n_iters):
        # row normalization (lane reduce)
        p = p / jnp.sum(p, axis=-1, keepdims=True)
        # column normalization (sublane reduce); padded cols get a neutral 1
        col_sum = jnp.sum(p, axis=-2, keepdims=True) + col_neutral
        p = p / col_sum

    p_ref[...] = p


def gumbel_sinkhorn_soft(u_padded, n, alpha=ALPHA, n_iters=N_ITERS):
    """u_padded: (n, LANES) uniform(0,1) f32.  Returns lane-dense (n, LANES) P."""
    rows, lanes = u_padded.shape
    kernel = functools.partial(_sinkhorn_kernel, alpha=alpha, n_iters=n_iters, n=n)
    return pl.pallas_call(
        kernel,
        out_shape=jax.ShapeDtypeStruct((rows, lanes), jnp.float32),
        grid=(1,),
        in_specs=[pl.BlockSpec((rows, lanes), lambda i: (0, 0))],
        out_specs=pl.BlockSpec((rows, lanes), lambda i: (0, 0)),
    )(u_padded)


# ---------------------------------------------------------------------------
# Host-side Hungarian matching (minimizing linear sum assignment).
# TODO(synk): linear_sum_assignment is a sequential discrete algorithm with no
#             clean Pallas equivalent; solved on host (scipy C impl preferred).
# ---------------------------------------------------------------------------
def _linear_sum_assignment_min_py(cost):
    cost = np.asarray(cost, dtype=np.float64)
    n = cost.shape[0]
    INF = float("inf")
    u = [0.0] * (n + 1)
    v = [0.0] * (n + 1)
    p = [0] * (n + 1)
    way = [0] * (n + 1)
    for i in range(1, n + 1):
        p[0] = i
        j0 = 0
        minv = [INF] * (n + 1)
        used = [False] * (n + 1)
        while True:
            used[j0] = True
            i0 = p[j0]
            delta = INF
            j1 = 0
            for j in range(1, n + 1):
                if not used[j]:
                    cur = cost[i0 - 1, j - 1] - u[i0] - v[j]
                    if cur < minv[j]:
                        minv[j] = cur
                        way[j] = j0
                    if minv[j] < delta:
                        delta = minv[j]
                        j1 = j
            for j in range(n + 1):
                if used[j]:
                    u[p[j]] += delta
                    v[j] -= delta
                else:
                    minv[j] -= delta
            j0 = j1
            if p[j0] == 0:
                break
        while True:
            j1 = way[j0]
            p[j0] = p[j1]
            j0 = j1
            if j0 == 0:
                break
    col_of_row = np.zeros(n, dtype=np.int32)
    for j in range(1, n + 1):
        col_of_row[p[j] - 1] = j - 1
    return col_of_row


def _matching(cost):
    """Returns col_of_row (perm) minimizing `cost` (== maximizing P for cost=-P)."""
    if _scipy_lsa is not None:
        _, col = _scipy_lsa(np.asarray(cost))
        return np.asarray(col, dtype=np.int32)
    return _linear_sum_assignment_min_py(cost)


# ---------------------------------------------------------------------------
# Full forward pass (matches the PyTorch module's forward: x -> x[perm]).
# Note: the RNG stream is JAX's, not torch.rand, so results are
# distributionally (not bitwise) equivalent to the PyTorch module.
# ---------------------------------------------------------------------------
def order_gumbel_sinkhorn_rand_permutation(x, key, alpha=ALPHA, n_iters=N_ITERS):
    n = x.shape[0]
    lanes = max(128, _round_up(n, 128))

    # Uniform noise drawn on device; kernel fuses Gumbel + identity + Sinkhorn.
    u = jax.random.uniform(key, (n, lanes), dtype=jnp.float32,
                           minval=0.0, maxval=1.0)
    p_padded = gumbel_sinkhorn_soft(u, n, alpha, n_iters)

    # np.asarray synchronizes; slice the lane padding off on the host.
    p_host = np.asarray(p_padded)[:, :n]

    # matching(): linear_sum_assignment(-P), then argmax(dim=-1) == col_of_row.
    perm = _matching(-p_host)  # (n,) int32

    # Row gather on device via plain XLA (per perf review: a second pallas_call
    # is pure launch overhead at this size).
    out = jnp.take(x, jnp.asarray(perm, dtype=jnp.int32), axis=0)
    return out, perm


if __name__ == "__main__":
    key = jax.random.PRNGKey(0)
    kx, kn = jax.random.split(key)

    n, d = 8, 32
    x = jax.random.normal(kx, (n, d), dtype=jnp.float32)

    out, perm = order_gumbel_sinkhorn_rand_permutation(
        x, kn, alpha=ALPHA, n_iters=N_ITERS)
    out = jax.block_until_ready(out)

    # sanity: output must be exactly the gathered rows x[perm]
    ref = np.asarray(x)[np.asarray(perm)]
    np.testing.assert_allclose(np.asarray(out), ref, rtol=0, atol=0)
    # sanity: perm is a valid permutation
    assert sorted(perm.tolist()) == list(range(n))

    print("KERNEL_OK")
</pallas_src>

<mosaic_0001>
module attributes {stable_mosaic.version = 11 : i64} {
  func.func @_sinkhorn_kernel(%arg0: i32, %arg1: memref<8x128xf32, #tpu.memory_space<vmem>>, %arg2: memref<8x128xf32, #tpu.memory_space<vmem>>) attributes {dimension_semantics = [#tpu.dimension_semantics<arbitrary>], iteration_bounds = array<i64: 1>, scalar_prefetch = 0 : i64, scratch_operands = 0 : i64, tpu.core_type = #tpu.core_type<tc>, window_params = [{pipeline_mode = #tpu.pipeline_mode<synchronous>, transform_indices = @transform_0, window_bounds = array<i64: 8, 128>}, {pipeline_mode = #tpu.pipeline_mode<synchronous>, transform_indices = @transform_1, window_bounds = array<i64: 8, 128>}]} {
    %c0 = arith.constant 0 : index
    %c0_0 = arith.constant 0 : index
    %0 = vector.load %arg1[%c0, %c0_0] : memref<8x128xf32, #tpu.memory_space<vmem>>, vector<8x128xf32>
    %cst = arith.constant 9.99999968E-21 : f32
    %1 = vector.broadcast %cst : f32 to vector<8x128xf32>
    %2 = arith.addf %0, %1 : vector<8x128xf32>
    %3 = math.log %2 : vector<8x128xf32>
    %cst_1 = arith.constant 0.000000e+00 : f32
    %4 = vector.broadcast %cst_1 : f32 to vector<8x128xf32>
    %5 = arith.subf %4, %3 : vector<8x128xf32>
    %cst_2 = arith.constant 9.99999968E-21 : f32
    %6 = vector.broadcast %cst_2 : f32 to vector<8x128xf32>
    %7 = arith.addf %5, %6 : vector<8x128xf32>
    %8 = math.log %7 : vector<8x128xf32>
    %cst_3 = arith.constant 0.000000e+00 : f32
    %9 = vector.broadcast %cst_3 : f32 to vector<8x128xf32>
    %10 = arith.subf %9, %8 : vector<8x128xf32>
    %11 = tpu.iota {dimensions = array<i32: 0>} : vector<8x128xi32>
    %12 = tpu.iota {dimensions = array<i32: 1>} : vector<8x128xi32>
    %13 = arith.cmpi eq, %11, %12 : vector<8x128xi32>
    %14 = arith.extui %13 : vector<8x128xi1> to vector<8x128xi32>
    %15 = arith.sitofp %14 : vector<8x128xi32> to vector<8x128xf32>
    %c8_i32 = arith.constant 8 : i32
    %16 = vector.broadcast %c8_i32 : i32 to vector<8x128xi32>
    %17 = arith.cmpi slt, %12, %16 : vector<8x128xi32>
    %18 = arith.extui %17 : vector<8x128xi1> to vector<8x128xi32>
    %19 = arith.sitofp %18 : vector<8x128xi32> to vector<8x128xf32>
    %20 = vector.extract_strided_slice %19 {offsets = [0, 0], sizes = [1, 128], strides = [1, 1]} : vector<8x128xf32> to vector<1x128xf32>
    %cst_4 = arith.constant 1.000000e+00 : f32
    %21 = vector.broadcast %cst_4 : f32 to vector<1x128xf32>
    %22 = arith.subf %21, %20 : vector<1x128xf32>
    %cst_5 = arith.constant 5.000000e-01 : f32
    %23 = vector.broadcast %cst_5 : f32 to vector<8x128xf32>
    %24 = arith.mulf %10, %23 : vector<8x128xf32>
    %25 = arith.addf %15, %24 : vector<8x128xf32>
    %26 = math.exp %25 : vector<8x128xf32>
    %27 = arith.mulf %26, %19 : vector<8x128xf32>
    %cst_6 = arith.constant dense<0.000000e+00> : vector<8xf32>
    %28 = vector.multi_reduction <add>, %27, %cst_6 [1] : vector<8x128xf32> to vector<8xf32>
    %29 = vector.shape_cast %28 : vector<8xf32> to vector<8x1xf32>
    %30 = vector.broadcast %29 : vector<8x1xf32> to vector<8x128xf32>
    %31 = arith.divf %27, %30 : vector<8x128xf32>
    %cst_7 = arith.constant dense<0.000000e+00> : vector<128xf32>
    %32 = vector.multi_reduction <add>, %31, %cst_7 [0] : vector<8x128xf32> to vector<128xf32>
    %33 = vector.shape_cast %32 : vector<128xf32> to vector<1x128xf32>
    %34 = arith.addf %33, %22 : vector<1x128xf32>
    %35 = vector.broadcast %34 : vector<1x128xf32> to vector<8x128xf32>
    %36 = arith.divf %31, %35 : vector<8x128xf32>
    %cst_8 = arith.constant dense<0.000000e+00> : vector<8xf32>
    %37 = vector.multi_reduction <add>, %36, %cst_8 [1] : vector<8x128xf32> to vector<8xf32>
    %38 = vector.shape_cast %37 : vector<8xf32> to vector<8x1xf32>
    %39 = vector.broadcast %38 : vector<8x1xf32> to vector<8x128xf32>
    %40 = arith.divf %36, %39 : vector<8x128xf32>
    %cst_9 = arith.constant dense<0.000000e+00> : vector<128xf32>
    %41 = vector.multi_reduction <add>, %40, %cst_9 [0] : vector<8x128xf32> to vector<128xf32>
    %42 = vector.shape_cast %41 : vector<128xf32> to vector<1x128xf32>
    %43 = arith.addf %42, %22 : vector<1x128xf32>
    %44 = vector.broadcast %43 : vector<1x128xf32> to vector<8x128xf32>
    %45 = arith.divf %40, %44 : vector<8x128xf32>
    %cst_10 = arith.constant dense<0.000000e+00> : vector<8xf32>
    %46 = vector.multi_reduction <add>, %45, %cst_10 [1] : vector<8x128xf32> to vector<8xf32>
    %47 = vector.shape_cast %46 : vector<8xf32> to vector<8x1xf32>
    %48 = vector.broadcast %47 : vector<8x1xf32> to vector<8x128xf32>
    %49 = arith.divf %45, %48 : vector<8x128xf32>
    %cst_11 = arith.constant dense<0.000000e+00> : vector<128xf32>
    %50 = vector.multi_reduction <add>, %49, %cst_11 [0] : vector<8x128xf32> to vector<128xf32>
    %51 = vector.shape_cast %50 : vector<128xf32> to vector<1x128xf32>
    %52 = arith.addf %51, %22 : vector<1x128xf32>
    %53 = vector.broadcast %52 : vector<1x128xf32> to vector<8x128xf32>
    %54 = arith.divf %49, %53 : vector<8x128xf32>
    %cst_12 = arith.constant dense<0.000000e+00> : vector<8xf32>
    %55 = vector.multi_reduction <add>, %54, %cst_12 [1] : vector<8x128xf32> to vector<8xf32>
    %56 = vector.shape_cast %55 : vector<8xf32> to vector<8x1xf32>
    %57 = vector.broadcast %56 : vector<8x1xf32> to vector<8x128xf32>
    %58 = arith.divf %54, %57 : vector<8x128xf32>
    %cst_13 = arith.constant dense<0.000000e+00> : vector<128xf32>
    %59 = vector.multi_reduction <add>, %58, %cst_13 [0] : vector<8x128xf32> to vector<128xf32>
    %60 = vector.shape_cast %59 : vector<128xf32> to vector<1x128xf32>
    %61 = arith.addf %60, %22 : vector<1x128xf32>
    %62 = vector.broadcast %61 : vector<1x128xf32> to vector<8x128xf32>
    %63 = arith.divf %58, %62 : vector<8x128xf32>
    %cst_14 = arith.constant dense<0.000000e+00> : vector<8xf32>
    %64 = vector.multi_reduction <add>, %63, %cst_14 [1] : vector<8x128xf32> to vector<8xf32>
    %65 = vector.shape_cast %64 : vector<8xf32> to vector<8x1xf32>
    %66 = vector.broadcast %65 : vector<8x1xf32> to vector<8x128xf32>
    %67 = arith.divf %63, %66 : vector<8x128xf32>
    %cst_15 = arith.constant dense<0.000000e+00> : vector<128xf32>
    %68 = vector.multi_reduction <add>, %67, %cst_15 [0] : vector<8x128xf32> to vector<128xf32>
    %69 = vector.shape_cast %68 : vector<128xf32> to vector<1x128xf32>
    %70 = arith.addf %69, %22 : vector<1x128xf32>
    %71 = vector.broadcast %70 : vector<1x128xf32> to vector<8x128xf32>
    %72 = arith.divf %67, %71 : vector<8x128xf32>
    %cst_16 = arith.constant dense<0.000000e+00> : vector<8xf32>
    %73 = vector.multi_reduction <add>, %72, %cst_16 [1] : vector<8x128xf32> to vector<8xf32>
    %74 = vector.shape_cast %73 : vector<8xf32> to vector<8x1xf32>
    %75 = vector.broadcast %74 : vector<8x1xf32> to vector<8x128xf32>
    %76 = arith.divf %72, %75 : vector<8x128xf32>
    %cst_17 = arith.constant dense<0.000000e+00> : vector<128xf32>
    %77 = vector.multi_reduction <add>, %76, %cst_17 [0] : vector<8x128xf32> to vector<128xf32>
    %78 = vector.shape_cast %77 : vector<128xf32> to vector<1x128xf32>
    %79 = arith.addf %78, %22 : vector<1x128xf32>
    %80 = vector.broadcast %79 : vector<1x128xf32> to vector<8x128xf32>
    %81 = arith.divf %76, %80 : vector<8x128xf32>
    %cst_18 = arith.constant dense<0.000000e+00> : vector<8xf32>
    %82 = vector.multi_reduction <add>, %81, %cst_18 [1] : vector<8x128xf32> to vector<8xf32>
    %83 = vector.shape_cast %82 : vector<8xf32> to vector<8x1xf32>
    %84 = vector.broadcast %83 : vector<8x1xf32> to vector<8x128xf32>
    %85 = arith.divf %81, %84 : vector<8x128xf32>
    %cst_19 = arith.constant dense<0.000000e+00> : vector<128xf32>
    %86 = vector.multi_reduction <add>, %85, %cst_19 [0] : vector<8x128xf32> to vector<128xf32>
    %87 = vector.shape_cast %86 : vector<128xf32> to vector<1x128xf32>
    %88 = arith.addf %87, %22 : vector<1x128xf32>
    %89 = vector.broadcast %88 : vector<1x128xf32> to vector<8x128xf32>
    %90 = arith.divf %85, %89 : vector<8x128xf32>
    %cst_20 = arith.constant dense<0.000000e+00> : vector<8xf32>
    %91 = vector.multi_reduction <add>, %90, %cst_20 [1] : vector<8x128xf32> to vector<8xf32>
    %92 = vector.shape_cast %91 : vector<8xf32> to vector<8x1xf32>
    %93 = vector.broadcast %92 : vector<8x1xf32> to vector<8x128xf32>
    %94 = arith.divf %90, %93 : vector<8x128xf32>
    %cst_21 = arith.constant dense<0.000000e+00> : vector<128xf32>
    %95 = vector.multi_reduction <add>, %94, %cst_21 [0] : vector<8x128xf32> to vector<128xf32>
    %96 = vector.shape_cast %95 : vector<128xf32> to vector<1x128xf32>
    %97 = arith.addf %96, %22 : vector<1x128xf32>
    %98 = vector.broadcast %97 : vector<1x128xf32> to vector<8x128xf32>
    %99 = arith.divf %94, %98 : vector<8x128xf32>
    %cst_22 = arith.constant dense<0.000000e+00> : vector<8xf32>
    %100 = vector.multi_reduction <add>, %99, %cst_22 [1] : vector<8x128xf32> to vector<8xf32>
    %101 = vector.shape_cast %100 : vector<8xf32> to vector<8x1xf32>
    %102 = vector.broadcast %101 : vector<8x1xf32> to vector<8x128xf32>
    %103 = arith.divf %99, %102 : vector<8x128xf32>
    %cst_23 = arith.constant dense<0.000000e+00> : vector<128xf32>
    %104 = vector.multi_reduction <add>, %103, %cst_23 [0] : vector<8x128xf32> to vector<128xf32>
    %105 = vector.shape_cast %104 : vector<128xf32> to vector<1x128xf32>
    %106 = arith.addf %105, %22 : vector<1x128xf32>
    %107 = vector.broadcast %106 : vector<1x128xf32> to vector<8x128xf32>
    %108 = arith.divf %103, %107 : vector<8x128xf32>
    %cst_24 = arith.constant dense<0.000000e+00> : vector<8xf32>
    %109 = vector.multi_reduction <add>, %108, %cst_24 [1] : vector<8x128xf32> to vector<8xf32>
    %110 = vector.shape_cast %109 : vector<8xf32> to vector<8x1xf32>
    %111 = vector.broadcast %110 : vector<8x1xf32> to vector<8x128xf32>
    %112 = arith.divf %108, %111 : vector<8x128xf32>
    %cst_25 = arith.constant dense<0.000000e+00> : vector<128xf32>
    %113 = vector.multi_reduction <add>, %112, %cst_25 [0] : vector<8x128xf32> to vector<128xf32>
    %114 = vector.shape_cast %113 : vector<128xf32> to vector<1x128xf32>
    %115 = arith.addf %114, %22 : vector<1x128xf32>
    %116 = vector.broadcast %115 : vector<1x128xf32> to vector<8x128xf32>
    %117 = arith.divf %112, %116 : vector<8x128xf32>
    %c0_26 = arith.constant 0 : index
    %c0_27 = arith.constant 0 : index
    %118 = vector.load %arg2[%c0_26, %c0_27] : memref<8x128xf32, #tpu.memory_space<vmem>>, vector<8x128xf32>
    tpu.vector_store %arg2[%c0_26, %c0_27], %117 {strides = array<i32>} : memref<8x128xf32, #tpu.memory_space<vmem>>, vector<8x128xf32>,
    return
  }
  func.func @transform_0(%arg0: i32) -> (i32, i32) {
    %c0_i32 = arith.constant 0 : i32
    %c0_i32_0 = arith.constant 0 : i32
    %c0_i32_1 = arith.constant 0 : i32
    return %c0_i32, %c0_i32_0 : i32, i32
  }
  func.func @transform_1(%arg0: i32) -> (i32, i32) {
    %c0_i32 = arith.constant 0 : i32
    %c0_i32_0 = arith.constant 0 : i32
    %c0_i32_1 = arith.constant 0 : i32
    return %c0_i32, %c0_i32_0 : i32, i32
  }
}

</mosaic_0001>

<bundles_post_ra>
// kernel: tpu_custom_call.1
= control target key start
LH: loop header
LB: loop body
LE: loop exit
PB: predicated region body
PF: predicated region fallthrough
CT: control target
= control target key end

     0   :  { %6 = vsyncpa [#allocation3], 0  ;;  %s340_s0 = inlined_call_operand.hbm [shape: f32[8,128], index: 0, kind: input, shape index: {}]   ;;  %s341_s1 = inlined_call_operand.hbm [shape: f32[8,128], index: 1, kind: output, shape index: {}]  }
   0x1   :  { %7 = vsyncpa [#allocation4], 0  ;;  %s291_s6 = smov [#allocation2]   ;;  %s243_s10 = scalar_lea.hbm %s340_s0, 128 }
   0x2   :  { %s14_s7 = sshll.u32 %s291_s6, 4  ;;  %p244_p0 = scmp.ne.s32.totalorder %s340_s0, %s243_s10  ;;  %s15_s7 = int_to_ptr.vmem [resolvable:$true] %s14_s7 }
   0x3   :  { %p247_p1 = scmp.lt.u32.totalorder %s243_s10, %s340_s0 }
   0x5   :  { %p249_p2 = pnand %p247_p1, %p244_p0 }
   0x7   :  { %252 = shalt.err (!%p249_p2)
}
   0x8   :  { %s253_s15 = scalar_lea.vmem %s15_s7, 128  ;;  %p258_p4 = scmp.lt.s32.totalorder %s15_s7, %s15_s7 }
   0x9   :  { %p254_p3 = scmp.ne.s32.totalorder %s15_s7, %s253_s15  ;;  %p259_p5 = scmp.lt.s32.totalorder %s253_s15, %s253_s15 }
   0xb   :  { %p260_p6 = por %p259_p5, %p258_p4 }
   0xd   :  { %p261_p7 = pnand %p260_p6, %p254_p3 }
   0xf   :  { %264 = shalt.err (!%p261_p7)
}
  0x10   :  { %17 = dma.hbm_to_vmem [thread:$0]  %s340_s0, 128, %s15_s7, [#allocation3]  }
  0x11   :  { %287 = dma.done.wait [#allocation3], 128  }
  0x12   :  { %288 = vsyncadd [#allocation3], 4294967168  ;;  %v21_v0 = vld [vmem:[#allocation2] sm:$0xff]  ;;  %v30_v6 = vlaneseq  ;;  %v292_v12 = vmov 0.0   ;;  %s293_s0 = smov [#allocation5]  }
  0x13   :  { %v22_v1 = vadd.f32 1e-20, %v21_v0  ;;  %s183_s18 = sshll.u32 %s293_s0, 4  ;;  %s184_s18 = int_to_ptr.vmem [resolvable:$true] %s183_s18 }
  0x14   :  { %v31_v7 = vshrl.u32 %v30_v6, 7  ;;  %v33_v8 = vand.u32 127, %v30_v6  ;;  %s265_s19 = scalar_lea.vmem %s184_s18, 128  ;;  %p270_p9 = scmp.lt.s32.totalorder %s184_s18, %s184_s18 }
  0x15   :  { %197 = vlog2.f32 %v22_v1  ;;  %p266_p8 = scmp.ne.s32.totalorder %s184_s18, %s265_s19  ;;  %p271_p10 = scmp.lt.s32.totalorder %s265_s19, %s265_s19 }
  0x16   :  { %vm34_vm0 = vcmp.eq.s32.totalorder %v31_v7, %v33_v8  ;;  %vm37_vm1 = vcmp.lt.s32.totalorder %v33_v8, 8 }
  0x17   :  { %v192_v13 = vsel %vm34_vm0, 1.0, %v292_v12  ;;  %v193_v17 = vsel %vm37_vm1, 1.0, %v292_v12  ;;  %p272_p11 = por %p271_p10, %p270_p9 }
  0x18   :  { %v316_v27 = vsub.f32 1.0, %v193_v17 }
  0x19   :  { %p273_p12 = pnand %p272_p11, %p266_p8 }
  0x1f   :  { %v198_v2 = vpop.eup %197 }
  0x20   :  { %v24_v3 = vmul.f32 0.6931472, %v198_v2 }
  0x22   :  { %v25_v4 = vsub.f32 0.0, %v24_v3 }
  0x24   :  { %v26_v5 = vadd.f32 1e-20, %v25_v4 }
  0x26   :  { %199 = vlog2.f32 %v26_v5 }
  0x30   :  { %v200_v9 = vpop.eup %199 }
  0x31   :  { %v28_v10 = vmul.f32 0.6931472, %v200_v9 }
  0x33   :  { %v29_v11 = vsub.f32 0.0, %v28_v10 }
  0x35   :  { %v41_v14 = vmul.f32 0.5, %v29_v11 }
  0x37   :  { %v42_v15 = vadd.f32 %v192_v13, %v41_v14 }
  0x39   :  { %v43_v16 = vmul.f32 1.442695, %v42_v15 }
  0x3b   :  { %201 = vpow2.f32 %v43_v16 }
  0x45   :  { %v202_v18 = vpop.eup %201 }
  0x46   :  { %v45_v19 = vmul.f32 %v202_v18, %v193_v17 }
  0x48   :  { %46 = vadd.xlane.f32.xlu0 %v45_v19 }
  0xd5   :  { %v47_v20 = vpop.xlane.xlu0 %46 }
  0xd6   :  { %203 = vrcp.f32 %v47_v20 }
  0xe0   :  { %v204_v21 = vpop.eup %203 }
  0xe1   :  { %v49_v22 = vmul.f32 %v204_v21, %v45_v19 }
  0xe3   :  { %v50_v23 = vrot.slane %v49_v22, 4 }
  0xe5   :  { %v51_v24 = vadd.f32 %v50_v23, %v49_v22 }
  0xe7   :  { %v52_v25 = vrot.slane %v51_v24, 2 }
  0xe9   :  { %v53_v26 = vadd.f32 %v52_v25, %v51_v24 }
  0xeb   :  { %v54_v28 = vrot.slane %v53_v26, 1 }
  0xed   :  { %v55_v29 = vadd.f32 %v54_v28, %v53_v26 }
  0xef   :  { %v56_v30 = vadd.f32 %v55_v29, %v316_v27 }
  0xf1   :  { %205 = vrcp.f32 %v56_v30 }
  0xfb   :  { %v206_v31 = vpop.eup %205 }
  0xfc   :  { %v58_v32 = vmul.f32 %v206_v31, %v49_v22 }
  0xfe   :  { %59 = vadd.xlane.f32.xlu0 %v58_v32 }
 0x18b   :  { %v60_v33 = vpop.xlane.xlu0 %59 }
 0x18c   :  { %207 = vrcp.f32 %v60_v33 }
 0x196   :  { %v208_v34 = vpop.eup %207 }
 0x197   :  { %v62_v35 = vmul.f32 %v208_v34, %v58_v32 }
 0x199   :  { %v63_v36 = vrot.slane %v62_v35, 4 }
 0x19b   :  { %v64_v37 = vadd.f32 %v63_v36, %v62_v35 }
 0x19d   :  { %v65_v38 = vrot.slane %v64_v37, 2 }
 0x19f   :  { %v66_v39 = vadd.f32 %v65_v38, %v64_v37 }
 0x1a1   :  { %v67_v40 = vrot.slane %v66_v39, 1 }
 0x1a3   :  { %v68_v41 = vadd.f32 %v67_v40, %v66_v39 }
 0x1a5   :  { %v69_v42 = vadd.f32 %v68_v41, %v316_v27 }
 0x1a7   :  { %209 = vrcp.f32 %v69_v42 }
 0x1b1   :  { %v210_v43 = vpop.eup %209 }
 0x1b2   :  { %v71_v44 = vmul.f32 %v210_v43, %v62_v35 }
 0x1b4   :  { %72 = vadd.xlane.f32.xlu1 %v71_v44 }
 0x241   :  { %v73_v45 = vpop.xlane.xlu1 %72 }
 0x242   :  { %211 = vrcp.f32 %v73_v45 }
 0x24c   :  { %v212_v46 = vpop.eup %211 }
 0x24d   :  { %v75_v47 = vmul.f32 %v212_v46, %v71_v44 }
 0x24f   :  { %v76_v48 = vrot.slane %v75_v47, 4 }
 0x251   :  { %v77_v49 = vadd.f32 %v76_v48, %v75_v47 }
 0x253   :  { %v78_v50 = vrot.slane %v77_v49, 2 }
 0x255   :  { %v79_v51 = vadd.f32 %v78_v50, %v77_v49 }
 0x257   :  { %v80_v52 = vrot.slane %v79_v51, 1 }
 0x259   :  { %v81_v53 = vadd.f32 %v80_v52, %v79_v51 }
 0x25b   :  { %v82_v54 = vadd.f32 %v81_v53, %v316_v27 }
 0x25d   :  { %213 = vrcp.f32 %v82_v54 }
 0x267   :  { %v214_v55 = vpop.eup %213 }
 0x268   :  { %v84_v56 = vmul.f32 %v214_v55, %v75_v47 }
 0x26a   :  { %85 = vadd.xlane.f32.xlu1 %v84_v56 }
 0x2f7   :  { %v86_v57 = vpop.xlane.xlu1 %85 }
 0x2f8   :  { %215 = vrcp.f32 %v86_v57 }
 0x302   :  { %v216_v58 = vpop.eup %215 }
 0x303   :  { %v88_v59 = vmul.f32 %v216_v58, %v84_v56 }
 0x305   :  { %v89_v60 = vrot.slane %v88_v59, 4 }
 0x307   :  { %v90_v61 = vadd.f32 %v89_v60, %v88_v59 }
 0x309   :  { %v91_v62 = vrot.slane %v90_v61, 2 }
 0x30b   :  { %v92_v63 = vadd.f32 %v91_v62, %v90_v61 }
 0x30d   :  { %v93_v0 = vrot.slane %v92_v63, 1 }
 0x30f   :  { %v94_v1 = vadd.f32 %v93_v0, %v92_v63 }
 0x311   :  { %v95_v2 = vadd.f32 %v94_v1, %v316_v27 }
 0x313   :  { %217 = vrcp.f32 %v95_v2 }
 0x31d   :  { %v218_v3 = vpop.eup %217 }
 0x31e   :  { %v97_v4 = vmul.f32 %v218_v3, %v88_v59 }
 0x320   :  { %98 = vadd.xlane.f32.xlu0 %v97_v4 }
 0x3ad   :  { %v99_v5 = vpop.xlane.xlu0 %98 }
 0x3ae   :  { %219 = vrcp.f32 %v99_v5 }
 0x3b8   :  { %v220_v6 = vpop.eup %219 }
 0x3b9   :  { %v101_v7 = vmul.f32 %v220_v6, %v97_v4 }
 0x3bb   :  { %v102_v8 = vrot.slane %v101_v7, 4 }
 0x3bd   :  { %v103_v9 = vadd.f32 %v102_v8, %v101_v7 }
 0x3bf   :  { %v104_v10 = vrot.slane %v103_v9, 2 }
 0x3c1   :  { %v105_v11 = vadd.f32 %v104_v10, %v103_v9 }
 0x3c3   :  { %v106_v12 = vrot.slane %v105_v11, 1 }
 0x3c5   :  { %v107_v13 = vadd.f32 %v106_v12, %v105_v11 }
 0x3c7   :  { %v108_v14 = vadd.f32 %v107_v13, %v316_v27 }
 0x3c9   :  { %221 = vrcp.f32 %v108_v14 }
 0x3d3   :  { %v222_v15 = vpop.eup %221 }
 0x3d4   :  { %v110_v16 = vmul.f32 %v222_v15, %v101_v7 }
 0x3d6   :  { %111 = vadd.xlane.f32.xlu1 %v110_v16 }
 0x463   :  { %v112_v17 = vpop.xlane.xlu1 %111 }
 0x464   :  { %223 = vrcp.f32 %v112_v17 }
 0x46e   :  { %v224_v18 = vpop.eup %223 }
 0x46f   :  { %v114_v19 = vmul.f32 %v224_v18, %v110_v16 }
 0x471   :  { %v115_v20 = vrot.slane %v114_v19, 4 }
 0x473   :  { %v116_v21 = vadd.f32 %v115_v20, %v114_v19 }
 0x475   :  { %v117_v22 = vrot.slane %v116_v21, 2 }
 0x477   :  { %v118_v23 = vadd.f32 %v117_v22, %v116_v21 }
 0x479   :  { %v119_v24 = vrot.slane %v118_v23, 1 }
 0x47b   :  { %v120_v25 = vadd.f32 %v119_v24, %v118_v23 }
 0x47d   :  { %v121_v26 = vadd.f32 %v120_v25, %v316_v27 }
 0x47f   :  { %225 = vrcp.f32 %v121_v26 }
 0x489   :  { %v226_v28 = vpop.eup %225 }
 0x48a   :  { %v123_v29 = vmul.f32 %v226_v28, %v114_v19 }
 0x48c   :  { %124 = vadd.xlane.f32.xlu0 %v123_v29 }
 0x519   :  { %v125_v30 = vpop.xlane.xlu0 %124 }
 0x51a   :  { %227 = vrcp.f32 %v125_v30 }
 0x524   :  { %v228_v31 = vpop.eup %227 }
 0x525   :  { %v127_v32 = vmul.f32 %v228_v31, %v123_v29 }
 0x527   :  { %v128_v33 = vrot.slane %v127_v32, 4 }
 0x529   :  { %v129_v34 = vadd.f32 %v128_v33, %v127_v32 }
 0x52b   :  { %v130_v35 = vrot.slane %v129_v34, 2 }
 0x52d   :  { %v131_v36 = vadd.f32 %v130_v35, %v129_v34 }
 0x52f   :  { %v132_v37 = vrot.slane %v131_v36, 1 }
 0x531   :  { %v133_v38 = vadd.f32 %v132_v37, %v131_v36 }
 0x533   :  { %v134_v39 = vadd.f32 %v133_v38, %v316_v27 }
 0x535   :  { %229 = vrcp.f32 %v134_v39 }
 0x53f   :  { %v230_v40 = vpop.eup %229 }
 0x540   :  { %v136_v41 = vmul.f32 %v230_v40, %v127_v32 }
 0x542   :  { %137 = vadd.xlane.f32.xlu1 %v136_v41 }
 0x5cf   :  { %v138_v42 = vpop.xlane.xlu1 %137 }
 0x5d0   :  { %231 = vrcp.f32 %v138_v42 }
 0x5da   :  { %v232_v43 = vpop.eup %231 }
 0x5db   :  { %v140_v44 = vmul.f32 %v232_v43, %v136_v41 }
 0x5dd   :  { %v141_v45 = vrot.slane %v140_v44, 4 }
 0x5df   :  { %v142_v46 = vadd.f32 %v141_v45, %v140_v44 }
 0x5e1   :  { %v143_v47 = vrot.slane %v142_v46, 2 }
 0x5e3   :  { %v144_v48 = vadd.f32 %v143_v47, %v142_v46 }
 0x5e5   :  { %v145_v49 = vrot.slane %v144_v48, 1 }
 0x5e7   :  { %v146_v50 = vadd.f32 %v145_v49, %v144_v48 }
 0x5e9   :  { %v147_v51 = vadd.f32 %v146_v50, %v316_v27 }
 0x5eb   :  { %233 = vrcp.f32 %v147_v51 }
 0x5f5   :  { %v234_v52 = vpop.eup %233 }
 0x5f6   :  { %v149_v53 = vmul.f32 %v234_v52, %v140_v44 }
 0x5f8   :  { %150 = vadd.xlane.f32.xlu0 %v149_v53 }
 0x685   :  { %v151_v54 = vpop.xlane.xlu0 %150 }
 0x686   :  { %235 = vrcp.f32 %v151_v54 }
 0x690   :  { %v236_v55 = vpop.eup %235 }
 0x691   :  { %v153_v56 = vmul.f32 %v236_v55, %v149_v53 }
 0x693   :  { %v154_v57 = vrot.slane %v153_v56, 4 }
 0x695   :  { %v155_v58 = vadd.f32 %v154_v57, %v153_v56 }
 0x697   :  { %v156_v59 = vrot.slane %v155_v58, 2 }
 0x699   :  { %v157_v60 = vadd.f32 %v156_v59, %v155_v58 }
 0x69b   :  { %v158_v61 = vrot.slane %v157_v60, 1 }
 0x69d   :  { %v159_v62 = vadd.f32 %v158_v61, %v157_v60 }
 0x69f   :  { %v160_v63 = vadd.f32 %v159_v62, %v316_v27 }
 0x6a1   :  { %237 = vrcp.f32 %v160_v63 }
 0x6ab   :  { %v238_v0 = vpop.eup %237 }
 0x6ac   :  { %v162_v1 = vmul.f32 %v238_v0, %v153_v56 }
 0x6ae   :  { %163 = vadd.xlane.f32.xlu1 %v162_v1 }
 0x73b   :  { %v164_v2 = vpop.xlane.xlu1 %163 }
 0x73c   :  { %239 = vrcp.f32 %v164_v2 }
 0x746   :  { %v240_v3 = vpop.eup %239 }
 0x747   :  { %v166_v4 = vmul.f32 %v240_v3, %v162_v1 }
 0x749   :  { %v167_v5 = vrot.slane %v166_v4, 4 }
 0x74b   :  { %v168_v6 = vadd.f32 %v167_v5, %v166_v4 }
 0x74d   :  { %v169_v7 = vrot.slane %v168_v6, 2 }
 0x74f   :  { %v170_v8 = vadd.f32 %v169_v7, %v168_v6 }
 0x751   :  { %v171_v9 = vrot.slane %v170_v8, 1 }
 0x753   :  { %v172_v10 = vadd.f32 %v171_v9, %v170_v8 }
 0x755   :  { %v173_v11 = vadd.f32 %v172_v10, %v316_v27 }
 0x757   :  { %241 = vrcp.f32 %v173_v11 }
 0x761   :  { %v242_v12 = vpop.eup %241 }
 0x762   :  { %v175_v13 = vmul.f32 %v242_v12, %v166_v4 }
 0x764   :  { %176 = vst [vmem:[#allocation5] sm:$0xff] %v175_v13 }
 0x765   :  { %276 = shalt.err (!%p273_p12)
}
 0x766   :  { %s277_s22 = scalar_lea.hbm %s341_s1, 128 }
 0x767   :  { %p278_p13 = scmp.ne.s32.totalorder %s341_s1, %s277_s22  ;;  %p281_p0 = scmp.lt.u32.totalorder %s277_s22, %s341_s1 }
 0x769   :  { %p283_p1 = pnand %p281_p0, %p278_p13 }
 0x76b   :  { %286 = shalt.err (!%p283_p1)
}
 0x76c   :  { %186 = dma.vmem_to_hbm [thread:$0]  %s184_s18, 128, %s341_s1, [#allocation4]  }
 0x76d   :  { %289 = dma.done.wait [#allocation4], 128  }
 0x76e   :  { %290 = vsyncadd [#allocation4], 4294967168 }
 0x76f   :  { %190 = vsyncpa [#allocation3], 1 }
 0x770   :  { %191 = vsyncpa [#allocation4], 1 }

</bundles_post_ra>
